<compile_context>
chip_gen: v7x
topology: tpu7x:2x2x1
jax: 0.10.0
libtpu: 0.0.40
codegen_flags: <defaults>
</compile_context>

<pallas_src>
import jax
import jax.numpy as jnp
from jax.experimental import pallas as pl
from jax.experimental.pallas import tpu as pltpu

_LANE = 128


def _round_up(n, m):
    return ((n + m - 1) // m) * m


def _mxu_dot(x, w):
    # Cast the activation tile down to a narrower weight dtype (bf16) so the
    # MXU runs in its native mode; accumulation is always f32.
    if (w.dtype != x.dtype
            and jnp.dtype(w.dtype).itemsize < jnp.dtype(x.dtype).itemsize):
        x = x.astype(w.dtype)
    return jnp.dot(x, w, preferred_element_type=jnp.float32)


# ---------------------------------------------------------------------------
# Kernels
# ---------------------------------------------------------------------------
def _classifier_kernel_fullk(x_ref, w_ref, b_ref, o_ref):
    # Full reduction strip in one MXU pass: x (tm, D_pad) @ w (D_pad, tn).
    acc = _mxu_dot(x_ref[...], w_ref[...])
    o_ref[...] = (acc + b_ref[...].astype(jnp.float32)).astype(o_ref.dtype)


def _classifier_kernel_kgrid_f32out(x_ref, w_ref, b_ref, o_ref):
    # Reduction axis on the grid; f32 output block is k-invariant and
    # VMEM-resident, so accumulate into it directly (no scratch).
    k = pl.program_id(2)

    @pl.when(k == 0)
    def _init():
        o_ref[...] = jnp.broadcast_to(
            b_ref[...].astype(o_ref.dtype), o_ref.shape)

    o_ref[...] += _mxu_dot(x_ref[...], w_ref[...])


def _classifier_kernel_kgrid_acc(x_ref, w_ref, b_ref, o_ref, acc_ref):
    # Reduction axis on the grid with an f32 scratch accumulator (used when
    # the output dtype is narrower than f32).
    k = pl.program_id(2)

    @pl.when(k == 0)
    def _init():
        acc_ref[...] = jnp.zeros_like(acc_ref)

    acc_ref[...] += _mxu_dot(x_ref[...], w_ref[...])

    @pl.when(k == pl.num_programs(2) - 1)
    def _finalize():
        y = acc_ref[...] + b_ref[...].astype(jnp.float32)
        o_ref[...] = y.astype(o_ref.dtype)


# ---------------------------------------------------------------------------
# Parameter prep (one-time, off the per-call path)
# ---------------------------------------------------------------------------
def prepare_classifier_params(weight, bias, weight_dtype=None):
    """Convert PyTorch-layout Linear params once.

    weight: (num_classes, input_dim) -> (D_pad, C_pad) transposed, zero-padded,
            optionally cast to `weight_dtype` (bf16 recommended for prod heads).
    bias:   (num_classes,)           -> (1, C_pad) float32.
    """
    C, D = weight.shape
    D_pad = _round_up(D, _LANE)
    C_pad = _round_up(C, _LANE)
    wdt = weight.dtype if weight_dtype is None else weight_dtype
    w_t = jnp.zeros((D_pad, C_pad), wdt).at[:D, :C].set(weight.T.astype(wdt))
    b2 = jnp.zeros((1, C_pad), jnp.float32).at[0, :C].set(
        bias.astype(jnp.float32))
    return w_t, b2


# ---------------------------------------------------------------------------
# Plan selection
# ---------------------------------------------------------------------------
def _vmem_budget():
    try:
        phys = int(pltpu.get_tpu_info().vmem_capacity_bytes)
    except Exception:  # pragma: no cover - conservative fallback
        phys = 64 << 20
    if phys <= (64 << 20):          # v7x-class: 64 MiB physical per TC
        budget = 40 << 20
    else:                            # v5e / v6e: 128 MiB physical
        budget = 96 << 20
    return phys, budget


def _choose_plan(B, D_pad, C_pad, x_it, w_it, o_it, budget):
    # Dtype-aware sublane multiple (packed sub-32-bit tiles).
    sub = {4: 8, 2: 16, 1: 32}.get(min(x_it, o_it), 8)

    # tm: single i-tile up to 512 rows (weight streamed once, minimal batch
    # padding); otherwise the largest candidate with the least padding waste.
    TM_CAP = 512
    t = _round_up(B, sub)
    if t <= TM_CAP:
        tm = t
    else:
        best_key, tm = None, sub
        for c in (512, 256, 128, 64, 32, 16, 8):
            if c < sub or c % sub:
                continue
            key = (_round_up(B, c) - B, -c)
            if best_key is None or key < best_key:
                best_key, tm = key, c
    B_pad = _round_up(B, tm)
    gi = B_pad // tm

    def fullk_bytes(tn_):
        return (2 * tm * D_pad * x_it + 2 * D_pad * tn_ * w_it
                + 2 * tn_ * 4 + 2 * tm * tn_ * o_it)

    def kgrid_bytes(tn_, tk_):
        return (2 * tm * tk_ * x_it + 2 * tk_ * tn_ * w_it + 2 * tn_ * 4
                + tm * tn_ * 4 + 2 * tm * tn_ * o_it)

    tn_cands = [c for c in (512, 256, 128) if C_pad % c == 0] or [C_pad]
    # v7x megacore: keep >= 2 independent (i, j) tiles when C_pad allows.
    if gi == 1 and C_pad >= 256:
        tn_cands = [c for c in tn_cands if C_pad // c >= 2] or tn_cands

    # Prefer the largest tn whose full-K (no reduction grid axis) plan fits.
    for tn in tn_cands:
        if fullk_bytes(tn) <= budget:
            return tm, tn, None, B_pad, fullk_bytes(tn)

    # Fall back to a reduction grid axis with the largest fitting tk.
    tn = tn_cands[-1]
    for tk in (2048, 1024, 512, 256, 128):
        if D_pad % tk == 0 and kgrid_bytes(tn, tk) <= budget:
            return tm, tn, tk, B_pad, kgrid_bytes(tn, tk)
    return tm, tn, 128, B_pad, kgrid_bytes(tn, 128)


# ---------------------------------------------------------------------------
# Forward
# ---------------------------------------------------------------------------
def classifier_forward(x, w_t, b2, num_classes, allow_xla_fast_path=False):
    """x: (B, input_dim); w_t: (D_pad, C_pad) pre-transposed; b2: (1, C_pad)."""
    B, D = x.shape
    D_pad, C_pad = w_t.shape

    # Dropout (eval-mode) is identity.
    # TODO(synk): training-mode dropout via pltpu.prng_seed + stateful_bernoulli.

    # Optional small-problem fast path (custom-call overhead dominates tiny
    # matmuls).  Off by default so the Pallas kernel is always exercised.
    if allow_xla_fast_path and B * D_pad * C_pad <= (1 << 18):
        y = jnp.dot(x.astype(w_t.dtype[:D].dtype) if False else x,
                    w_t[:D, :num_classes].astype(x.dtype))
        return y + b2[0, :num_classes].astype(x.dtype)

    x_it = jnp.dtype(x.dtype).itemsize
    w_it = jnp.dtype(w_t.dtype).itemsize
    o_it = x_it

    phys_vmem, budget = _vmem_budget()
    tm, tn, tk, B_pad, footprint = _choose_plan(
        B, D_pad, C_pad, x_it, w_it, o_it, budget)

    # Zero-pad activations if needed (zeros contribute nothing to the matmul).
    if (B_pad != B) or (D_pad != D):
        x_p = jnp.zeros((B_pad, D_pad), x.dtype).at[:B, :D].set(x)
    else:
        x_p = x

    gi, gj = B_pad // tm, C_pad // tn

    # vmem limit: actual pipeline footprint with headroom, per-generation cap.
    vmem_limit = int(min(max(2 * footprint, 16 << 20), phys_vmem - (8 << 20)))
    vmem_limit = max(vmem_limit, footprint + (2 << 20))

    out_shape = jax.ShapeDtypeStruct((B_pad, C_pad), x.dtype)

    if tk is None:
        # --- No reduction grid axis: one MXU pass per (i, j) tile. ---------
        cost = pl.CostEstimate(
            flops=2 * B_pad * D_pad * C_pad,
            transcendentals=0,
            bytes_accessed=(B_pad * D_pad * x_it            # x read once
                            + gi * D_pad * C_pad * w_it     # W streamed per i
                            + gi * C_pad * 4                # bias
                            + B_pad * C_pad * o_it),        # output write
        )
        out_padded = pl.pallas_call(
            _classifier_kernel_fullk,
            out_shape=out_shape,
            grid_spec=pltpu.PrefetchScalarGridSpec(
                num_scalar_prefetch=0,
                grid=(gi, gj),
                in_specs=[
                    pl.BlockSpec((tm, D_pad), lambda i, j: (i, 0)),   # x strip
                    pl.BlockSpec((D_pad, tn), lambda i, j: (0, j)),   # W strip
                    pl.BlockSpec((1, tn), lambda i, j: (0, j)),       # bias
                ],
                out_specs=pl.BlockSpec((tm, tn), lambda i, j: (i, j)),
            ),
            compiler_params=pltpu.CompilerParams(
                dimension_semantics=("parallel", "parallel"),
                vmem_limit_bytes=vmem_limit,
            ),
            cost_estimate=cost,
        )(x_p, w_t, b2)
    else:
        # --- Reduction axis on the grid (large D_pad fallback). ------------
        gk = D_pad // tk
        cost = pl.CostEstimate(
            flops=2 * B_pad * D_pad * C_pad,
            transcendentals=0,
            bytes_accessed=(gj * B_pad * D_pad * x_it       # x re-streamed / j
                            + gi * D_pad * C_pad * w_it     # W streamed per i
                            + gi * gj * tn * 4
                            + B_pad * C_pad * o_it),
        )
        f32_out = (out_shape.dtype == jnp.float32)
        kernel = (_classifier_kernel_kgrid_f32out if f32_out
                  else _classifier_kernel_kgrid_acc)
        scratch = [] if f32_out else [pltpu.VMEM((tm, tn), jnp.float32)]
        out_padded = pl.pallas_call(
            kernel,
            out_shape=out_shape,
            grid_spec=pltpu.PrefetchScalarGridSpec(
                num_scalar_prefetch=0,
                grid=(gi, gj, gk),
                in_specs=[
                    pl.BlockSpec((tm, tk), lambda i, j, k: (i, k)),
                    pl.BlockSpec((tk, tn), lambda i, j, k: (k, j)),
                    pl.BlockSpec((1, tn), lambda i, j, k: (0, j)),
                ],
                out_specs=pl.BlockSpec((tm, tn), lambda i, j, k: (i, j)),
                scratch_shapes=scratch,
            ),
            compiler_params=pltpu.CompilerParams(
                dimension_semantics=("parallel", "parallel", "arbitrary"),
                vmem_limit_bytes=vmem_limit,
            ),
            cost_estimate=cost,
        )(x_p, w_t, b2)

    # Slice away lane/batch padding (consumers that mask downstream can use
    # the padded logits directly instead).
    return out_padded[:B, :num_classes]


if __name__ == "__main__":
    # Small shapes consistent with the module: batch=8, input_dim=32, classes=10.
    batch, input_dim, num_classes = 8, 32, 10

    key = jax.random.PRNGKey(0)
    kx, kw, kb = jax.random.split(key, 3)

    x = jax.random.normal(kx, (batch, input_dim), dtype=jnp.float32)
    # Deterministic parameter init (mimics nn.Linear's uniform init range).
    bound = 1.0 / (input_dim ** 0.5)
    weight = jax.random.uniform(kw, (num_classes, input_dim),
                                minval=-bound, maxval=bound, dtype=jnp.float32)
    bias = jax.random.uniform(kb, (num_classes,),
                              minval=-bound, maxval=bound, dtype=jnp.float32)

    ref = x @ weight.T + bias

    # --- f32-weight path: exact numerics vs. the reference -----------------
    w_t, b2 = prepare_classifier_params(weight, bias)
    out = jax.block_until_ready(classifier_forward(x, w_t, b2, num_classes))
    assert out.shape == (batch, num_classes)
    assert jnp.allclose(out, ref, atol=1e-5, rtol=1e-5)

    # --- bf16-weight path (recommended for bandwidth-bound production heads)
    w_t16, b2_16 = prepare_classifier_params(
        weight, bias, weight_dtype=jnp.bfloat16)
    out16 = jax.block_until_ready(
        classifier_forward(x, w_t16, b2_16, num_classes))
    assert out16.shape == (batch, num_classes)
    assert jnp.allclose(out16, ref, atol=5e-2, rtol=5e-2)

    print("KERNEL_OK")
</pallas_src>

<mosaic_0001>
module attributes {stable_mosaic.version = 11 : i64} {
  func.func @_classifier_kernel_fullk(%arg0: i32, %arg1: i32, %arg2: memref<8x128xf32, #tpu.memory_space<vmem>>, %arg3: memref<128x128xf32, #tpu.memory_space<vmem>>, %arg4: memref<1x128xf32, #tpu.memory_space<vmem>>, %arg5: memref<8x128xf32, #tpu.memory_space<vmem>>) attributes {dimension_semantics = [#tpu.dimension_semantics<parallel>, #tpu.dimension_semantics<parallel>], iteration_bounds = array<i64: 1, 1>, scalar_prefetch = 0 : i64, scratch_operands = 0 : i64, tpu.core_type = #tpu.core_type<tc>, window_params = [{transform_indices = @transform_0, window_bounds = array<i64: 8, 128>}, {transform_indices = @transform_1, window_bounds = array<i64: 128, 128>}, {transform_indices = @transform_2, window_bounds = array<i64: 1, 128>}, {transform_indices = @transform_3, window_bounds = array<i64: 8, 128>}]} {
    %c0 = arith.constant 0 : index
    %c0_0 = arith.constant 0 : index
    %0 = vector.load %arg2[%c0, %c0_0] : memref<8x128xf32, #tpu.memory_space<vmem>>, vector<8x128xf32>
    %c0_1 = arith.constant 0 : index
    %c0_2 = arith.constant 0 : index
    %1 = vector.load %arg3[%c0_1, %c0_2] : memref<128x128xf32, #tpu.memory_space<vmem>>, vector<128x128xf32>
    %cst = arith.constant dense<0.000000e+00> : vector<8x128xf32>
    %2 = tpu.matmul %0, %1, %cst {dimension_numbers = #tpu.dot_dimension_numbers<[1], [0], [0], [1], [0, 0, 1, 1], [], []>} : vector<8x128xf32>, vector<128x128xf32>, vector<8x128xf32> -> vector<8x128xf32>
    %c0_3 = arith.constant 0 : index
    %c0_4 = arith.constant 0 : index
    %3 = vector.load %arg4[%c0_3, %c0_4] : memref<1x128xf32, #tpu.memory_space<vmem>>, vector<1x128xf32>
    %4 = vector.broadcast %3 : vector<1x128xf32> to vector<8x128xf32>
    %5 = arith.addf %2, %4 : vector<8x128xf32>
    %c0_5 = arith.constant 0 : index
    %c0_6 = arith.constant 0 : index
    %6 = vector.load %arg5[%c0_5, %c0_6] : memref<8x128xf32, #tpu.memory_space<vmem>>, vector<8x128xf32>
    tpu.vector_store %arg5[%c0_5, %c0_6], %5 {strides = array<i32>} : memref<8x128xf32, #tpu.memory_space<vmem>>, vector<8x128xf32>,
    return
  }
  func.func @transform_0(%arg0: i32, %arg1: i32) -> (i32, i32) {
    %c0_i32 = arith.constant 0 : i32
    %c0_i32_0 = arith.constant 0 : i32
    return %arg0, %c0_i32 : i32, i32
  }
  func.func @transform_1(%arg0: i32, %arg1: i32) -> (i32, i32) {
    %c0_i32 = arith.constant 0 : i32
    %c0_i32_0 = arith.constant 0 : i32
    return %c0_i32, %arg1 : i32, i32
  }
  func.func @transform_2(%arg0: i32, %arg1: i32) -> (i32, i32) {
    %c0_i32 = arith.constant 0 : i32
    %c0_i32_0 = arith.constant 0 : i32
    return %c0_i32, %arg1 : i32, i32
  }
  func.func @transform_3(%arg0: i32, %arg1: i32) -> (i32, i32) {
    %c0_i32 = arith.constant 0 : i32
    return %arg0, %arg1 : i32, i32
  }
}

</mosaic_0001>

<bundles_post_ra>
// kernel: tpu_custom_call.1
= control target key start
LH: loop header
LB: loop body
LE: loop exit
PB: predicated region body
PF: predicated region fallthrough
CT: control target
= control target key end

     0   :  { %8 = vsyncpa [#allocation3], 0  ;;  %s383_s0 = inlined_call_operand.hbm [shape: f32[8,128], index: 0, kind: input, shape index: {}]   ;;  %s384_s1 = inlined_call_operand.hbm [shape: f32[128,128], index: 1, kind: input, shape index: {}]   ;;  %s385_s2 = inlined_call_operand.vmem [shape: f32[1,128], index: 2, kind: input, shape index: {}]   ;;  %s386_s3 = inlined_call_operand.hbm [shape: f32[8,128], index: 3, kind: output, shape index: {}]  }
   0x1   :  { %9 = vsyncpa [#allocation6], 0 }
   0x2   :  { %10 = vsyncpa [#allocation4], 0  ;;  %s309_s12 = smov [#allocation2]   ;;  %s310_s14 = smov [#allocation5]  }
   0x3   :  { %s17_s13 = sshll.u32 %s309_s12, 4  ;;  %s26_s15 = sshll.u32 %s310_s14, 4  ;;  %s18_s13 = int_to_ptr.vmem [resolvable:$true] %s17_s13  ;;  %s337_s15 = int_to_ptr.vmem [resolvable:$true] %s26_s15 }
   0x4   :  { %s237_s18 = scalar_lea.hbm %s383_s0, 128 }
   0x5   :  { %p238_p0 = scmp.ne.s32.totalorder %s383_s0, %s237_s18  ;;  %p241_p1 = scmp.lt.u32.totalorder %s237_s18, %s383_s0 }
   0x7   :  { %p243_p2 = pnand %p241_p1, %p238_p0 }
   0x9   :  { %246 = shalt.err (!%p243_p2)
}
   0xa   :  { %s247_s23 = scalar_lea.vmem %s18_s13, 128  ;;  %p252_p4 = scmp.lt.s32.totalorder %s18_s13, %s18_s13 }
   0xb   :  { %p248_p3 = scmp.ne.s32.totalorder %s18_s13, %s247_s23  ;;  %p253_p5 = scmp.lt.s32.totalorder %s247_s23, %s247_s23 }
   0xd   :  { %p254_p6 = por %p253_p5, %p252_p4 }
   0xf   :  { %p255_p7 = pnand %p254_p6, %p248_p3 }
  0x11   :  { %258 = shalt.err (!%p255_p7)
}
  0x12   :  { %20 = dma.hbm_to_vmem [thread:$0]  %s383_s0, 128, %s18_s13, [#allocation3]  }
  0x13   :  { %s259_s28 = scalar_lea.hbm %s384_s1, 2048 }
  0x14   :  { %p260_p8 = scmp.ne.s32.totalorder %s384_s1, %s259_s28  ;;  %p263_p9 = scmp.lt.u32.totalorder %s259_s28, %s384_s1 }
  0x16   :  { %p265_p10 = pnand %p263_p9, %p260_p8 }
  0x18   :  { %268 = shalt.err (!%p265_p10)
}
  0x19   :  { %s269_s6 = scalar_lea.vmem %s337_s15, 2048  ;;  %p274_p12 = scmp.lt.s32.totalorder %s337_s15, %s337_s15 }
  0x1a   :  { %p270_p11 = scmp.ne.s32.totalorder %s337_s15, %s269_s6  ;;  %p275_p13 = scmp.lt.s32.totalorder %s269_s6, %s269_s6 }
  0x1c   :  { %p276_p0 = por %p275_p13, %p274_p12 }
  0x1e   :  { %p277_p1 = pnand %p276_p0, %p270_p11 }
  0x20   :  { %280 = shalt.err (!%p277_p1)
}
  0x21   :  { %s311_s0 = smov 128   ;;  %s312_s7 = smov 8  }
  0x22   :  { %32 = dma.hbm_to_vmem [thread:$0]  %s384_s1, 2048, %s337_s15, [#allocation6], %s311_s0, %s311_s0, %s312_s7  }
  0x23   :  { %303 = dma.done.wait [#allocation3], 128  }
  0x24   :  { %304 = vsyncadd [#allocation3], 4294967168 }
  0x25   :  { %305 = dma.done.wait [#allocation6], 2048  }
  0x26   :  { %306 = vsyncadd [#allocation6], 4294965248  ;;  %v313_v0 = vmov 0.0|0.0   ;;  %vm314_vm0 = vmmov 0   ;;  %v315_v1 = vmov 0.0   ;;  %v42_v2 = vld [vmem:[#allocation5] sm:$0xff] }
  0x27   :  { %205 = vmatprep.subr.bf16.mxu0 %v313_v0  ;;  %202 = vmatprep.mubr.msk.f32.mxu0 %vm314_vm0, %v315_v1  ;;  %v43_v3 = vld [vmem:[#allocation5 + $0x8] sm:$0xff]  ;;  %v44_v4 = vld [vmem:[#allocation5 + $0x10] sm:$0xff]  ;;  %v45_v6 = vld [vmem:[#allocation5 + $0x18] sm:$0xff]  ;;  %s316_s11 = smov [#allocation7]  }
  0x28   :  { %v206_v5 = vpack.c.bf16 %v43_v3, %v42_v2  ;;  %v209_v7 = vpack.c.bf16 %v45_v6, %v44_v4  ;;  %v46_v8 = vld [vmem:[#allocation5 + $0x20] sm:$0xff]  ;;  %v47_v9 = vld [vmem:[#allocation5 + $0x28] sm:$0xff]  ;;  %v48_v11 = vld [vmem:[#allocation5 + $0x30] sm:$0xff]  ;;  %s142_s12 = sshll.u32 %s316_s11, 4  ;;  %s143_s12 = int_to_ptr.vmem [resolvable:$true] %s142_s12 }
  0x29   :  { %v212_v10 = vpack.c.bf16 %v47_v9, %v46_v8  ;;  %v49_v12 = vld [vmem:[#allocation5 + $0x38] sm:$0xff]  ;;  %v50_v14 = vld [vmem:[#allocation5 + $0x40] sm:$0xff]  ;;  %v51_v15 = vld [vmem:[#allocation5 + $0x48] sm:$0xff]  ;;  %s281_s13 = scalar_lea.vmem %s143_s12, 128  ;;  %p286_p3 = scmp.lt.s32.totalorder %s143_s12, %s143_s12 }
  0x2a   :  { %207 = vmatpush3.bf16.msra.mxu0 %v206_v5  ;;  %v215_v13 = vpack.c.bf16 %v49_v12, %v48_v11  ;;  %v218_v16 = vpack.c.bf16 %v51_v15, %v50_v14  ;;  %v52_v17 = vld [vmem:[#allocation5 + $0x50] sm:$0xff]  ;;  %v53_v18 = vld [vmem:[#allocation5 + $0x58] sm:$0xff]  ;;  %v54_v20 = vld [vmem:[#allocation5 + $0x60] sm:$0xff]  ;;  %p282_p2 = scmp.ne.s32.totalorder %s143_s12, %s281_s13  ;;  %p287_p4 = scmp.lt.s32.totalorder %s281_s13, %s281_s13 }
  0x2b   :  { %208 = vmatprep.subr.bf16.mxu0 %v313_v0  ;;  %v221_v19 = vpack.c.bf16 %v53_v18, %v52_v17  ;;  %v55_v21 = vld [vmem:[#allocation5 + $0x68] sm:$0xff]  ;;  %v56_v23 = vld [vmem:[#allocation5 + $0x70] sm:$0xff]  ;;  %v57_v24 = vld [vmem:[#allocation5 + $0x78] sm:$0xff] }
  0x2c   :  { %v224_v22 = vpack.c.bf16 %v55_v21, %v54_v20  ;;  %v227_v25 = vpack.c.bf16 %v57_v24, %v56_v23  ;;  %v41_v26 = vld [vmem:[#allocation2] sm:$0xff]  ;;  %p288_p5 = por %p287_p4, %p286_p3 }
  0x2d   :  { %v152_v27 = vld [vmem:[%s385_s2] ss:$0 sm:$0xff] }
  0x2e   :  { %210 = vmatpush3.bf16.msra.mxu0 %v209_v7  ;;  %p289_p6 = pnand %p288_p5, %p282_p2 }
  0x2f   :  { %211 = vmatprep.subr.bf16.mxu0 %v313_v0 }
  0x32   :  { %213 = vmatpush3.bf16.msra.mxu0 %v212_v10 }
  0x33   :  { %214 = vmatprep.subr.bf16.mxu0 %v313_v0 }
  0x36   :  { %216 = vmatpush3.bf16.msra.mxu0 %v215_v13 }
  0x37   :  { %217 = vmatprep.subr.bf16.mxu0 %v313_v0 }
  0x3a   :  { %219 = vmatpush3.bf16.msra.mxu0 %v218_v16 }
  0x3b   :  { %220 = vmatprep.subr.bf16.mxu0 %v313_v0 }
  0x3e   :  { %222 = vmatpush3.bf16.msra.mxu0 %v221_v19 }
  0x3f   :  { %223 = vmatprep.subr.bf16.mxu0 %v313_v0 }
  0x42   :  { %225 = vmatpush3.bf16.msra.mxu0 %v224_v22 }
  0x43   :  { %226 = vmatprep.subr.bf16.mxu0 %v313_v0 }
  0x46   :  { %228 = vmatpush3.bf16.msra.mxu0 %v227_v25 }
  0x49   :  { %203 = vmatmul.mubr.f32.vlgmr.msra.gmra.mrb[0].mxu0 %v41_v26 }
 0x11c   :  { %v131_v28 = vpop.f32.mrb[0].mxu0 }
 0x11d   :  { %v132_v29 = vadd.f32 %v152_v27, %v131_v28  ;;  %v204_v30 = vpop.f32.mrb[1].mxu0 }
 0x11f   :  { %135 = vst [vmem:[#allocation7] sm:$0xff] %v132_v29 }
 0x120   :  { %292 = shalt.err (!%p289_p6)
}
 0x121   :  { %s293_s16 = scalar_lea.hbm %s386_s3, 128 }
 0x122   :  { %p294_p7 = scmp.ne.s32.totalorder %s386_s3, %s293_s16  ;;  %p297_p8 = scmp.lt.u32.totalorder %s293_s16, %s386_s3 }
 0x124   :  { %p299_p9 = pnand %p297_p8, %p294_p7 }
 0x126   :  { %302 = shalt.err (!%p299_p9)
}
 0x127   :  { %145 = dma.vmem_to_hbm [thread:$0]  %s143_s12, 128, %s386_s3, [#allocation4]  }
 0x128   :  { %307 = dma.done.wait [#allocation4], 128  }
 0x129   :  { %308 = vsyncadd [#allocation4], 4294967168 }
 0x12a   :  { %149 = vsyncpa [#allocation3], 1 }
 0x12b   :  { %150 = vsyncpa [#allocation6], 1 }
 0x12c   :  { %151 = vsyncpa [#allocation4], 1 }

</bundles_post_ra>
